<compile_context>
chip_gen: v7x
topology: tpu7x:2x2x1
jax: 0.10.0
libtpu: 0.0.40
codegen_flags: <defaults>
</compile_context>

<pallas_src>
import functools

import jax
import jax.numpy as jnp
from jax.experimental import pallas as pl
from jax.experimental.pallas import tpu as pltpu


_LANE = 128
# Soft cap for the kernel's own VMEM footprint, sized against v7x's 64 MiB
# physical VMEM (v5e/v6e have 128 MiB) with >=16 MiB headroom left for the
# compiler; vmem_limit_bytes passed to Mosaic is capped at 48 MiB.
_VMEM_SOFT_CAP = 40 << 20
_VMEM_LIMIT_CAP = 48 << 20


def _round_up(x, m):
    return ((x + m - 1) // m) * m


def _lane_pad(n):
    return _round_up(max(int(n), 1), _LANE)


def _num_tensorcores():
    """Best-effort TensorCore count of the local device (v5e/v6e: 1, v7x: 2)."""
    try:
        d = jax.devices()[0]
        nc = int(getattr(d, "num_cores", 1) or 1)
        kind = str(getattr(d, "device_kind", "")).lower()
        if "v7" in kind:
            nc = max(nc, 2)
        return max(nc, 1)
    except Exception:
        return 1


def _vmem_estimate(tm, in_dim, hidden, out_dim, x_itemsize, out_itemsize,
                   nbuf_io):
    """Lane-padded VMEM footprint estimate (naive byte math undercounts ~2-3x:
    the (tm, in_dim) and (tm, out_dim) blocks pad their last dim to 128)."""
    x_block = nbuf_io * tm * _lane_pad(in_dim) * x_itemsize
    o_block = nbuf_io * tm * _lane_pad(out_dim) * out_itemsize
    # f32 h / y intermediates materialized in VMEM by the compiler.
    interm = 2 * tm * _lane_pad(max(hidden, out_dim)) * 4
    # Resident weights/biases (pipeline still allocates 2 buffers, but tiny).
    weights = 2 * 4 * (_round_up(in_dim, 8) * _lane_pad(hidden)
                       + _round_up(hidden, 8) * _lane_pad(out_dim)
                       + 8 * _lane_pad(hidden) + 8 * _lane_pad(out_dim))
    return x_block + o_block + interm + weights


def _io_block_spec(shape, index_map, buffers):
    """BlockSpec with N-deep buffering when supported; plain spec otherwise."""
    if buffers != 2:
        try:
            return pl.BlockSpec(shape, index_map,
                                pipeline_mode=pl.Buffered(buffers))
        except TypeError:
            pass
    return pl.BlockSpec(shape, index_map)


def _mlp_kernel(x_ref, w1_ref, b1_ref, w2_ref, b2_ref, o_ref):
    # x_ref:  (tm, in_dim)
    # w1_ref: (in_dim, hidden)   b1_ref: (1, hidden)
    # w2_ref: (hidden, out_dim)  b2_ref: (1, out_dim)
    # o_ref:  (tm, out_dim)
    # Layer 1: native-dtype operands straight into the MXU, f32 accumulation,
    # f32 bias + ReLU epilogue.
    h = jnp.dot(x_ref[...], w1_ref[...], preferred_element_type=jnp.float32)
    h = jnp.maximum(h + b1_ref[...].astype(jnp.float32), 0.0)

    # Layer 2: explicit operand dtype for the second matmul, independent of
    # x's dtype semantics: keep f32 for f32 inputs (bit-matches an f32
    # reference); use MXU-native bf16 only for narrower float inputs.
    mm_dtype = jnp.float32 if x_ref.dtype == jnp.float32 else jnp.bfloat16
    y = jnp.dot(h.astype(mm_dtype), w2_ref[...],
                preferred_element_type=jnp.float32)
    y = jnp.maximum(y + b2_ref[...].astype(jnp.float32), 0.0)

    o_ref[...] = y.astype(o_ref.dtype)   # downcast only at the final store


@functools.partial(jax.jit, static_argnames=("tm",))
def candidate_encoder_simple(x, w1, b1, w2, b2, *, tm=4096):
    """
    x:  (N, k, in_dim)
    w1: (in_dim, hidden), b1: (hidden,)
    w2: (hidden, out_dim), b2: (out_dim,)
    returns: (N, k, out_dim)
    """
    N, k, in_dim = x.shape
    hidden = w1.shape[1]
    out_dim = w2.shape[1]
    M = N * k

    x2 = x.reshape(M, in_dim)          # contiguous reshape: no HBM copy
    b1_2d = b1.reshape(1, hidden)
    b2_2d = b2.reshape(1, out_dim)

    x_itemsize = x.dtype.itemsize
    # Minimum sublane tile: 8 rows for 32-bit dtypes, 16 for 16-bit (bf16
    # packs two rows per sublane).
    min_tile = 8 if x_itemsize >= 4 else 16

    num_tc = _num_tensorcores()
    if num_tc > 1:
        # v7x megacore: aim for >= 2 steps per TensorCore so the ragged last
        # block causes less load imbalance.
        target_steps = 2 * num_tc
        tm_eff = max(min_tile,
                     min(tm, _round_up(pl.cdiv(M, target_steps), min_tile)))
    else:
        # Single TensorCore (v5e/v6e): one full-size step for small/medium M;
        # splitting only adds ~0.35us/step overhead and an extra ragged tail.
        tm_eff = max(min_tile, min(tm, _round_up(M, min_tile)))

    # Shrink the tile until the lane-padded footprint fits the VMEM budget
    # (sized against v7x's 64 MiB physical VMEM).
    while (tm_eff > min_tile
           and _vmem_estimate(tm_eff, in_dim, hidden, out_dim,
                              x_itemsize, x_itemsize, 2) > _VMEM_SOFT_CAP):
        tm_eff = max(min_tile, _round_up(tm_eff // 2, min_tile))

    steps = pl.cdiv(M, tm_eff)
    grid = (steps,)

    # 3-deep buffering on the x / out streams hides DMA start latency behind
    # the very short per-step compute; only when it fits and the grid is long
    # enough for it to matter.
    nbuf_io = 2
    if steps >= 3 and _vmem_estimate(tm_eff, in_dim, hidden, out_dim,
                                     x_itemsize, x_itemsize,
                                     3) <= _VMEM_SOFT_CAP:
        nbuf_io = 3

    vmem_limit = int(min(
        _VMEM_LIMIT_CAP,
        max(16 << 20,
            _vmem_estimate(tm_eff, in_dim, hidden, out_dim,
                           x_itemsize, x_itemsize, nbuf_io) + (8 << 20))))

    flops = 2 * M * (in_dim * hidden + hidden * out_dim)
    bytes_accessed = (
        M * in_dim * x_itemsize + M * out_dim * x_itemsize
        + w1.size * w1.dtype.itemsize + w2.size * w2.dtype.itemsize
        + b1.size * b1.dtype.itemsize + b2.size * b2.dtype.itemsize)

    out = pl.pallas_call(
        _mlp_kernel,
        out_shape=jax.ShapeDtypeStruct((M, out_dim), x.dtype),
        grid_spec=pltpu.PrefetchScalarGridSpec(
            num_scalar_prefetch=0,
            grid=grid,
            in_specs=[
                _io_block_spec((tm_eff, in_dim), lambda i: (i, 0), nbuf_io),   # x rows
                pl.BlockSpec((in_dim, hidden), lambda i: (0, 0)),    # w1 (resident)
                pl.BlockSpec((1, hidden), lambda i: (0, 0)),         # b1 (resident)
                pl.BlockSpec((hidden, out_dim), lambda i: (0, 0)),   # w2 (resident)
                pl.BlockSpec((1, out_dim), lambda i: (0, 0)),        # b2 (resident)
            ],
            out_specs=_io_block_spec((tm_eff, out_dim), lambda i: (i, 0), nbuf_io),
        ),
        compiler_params=pltpu.CompilerParams(
            dimension_semantics=("parallel",),
            vmem_limit_bytes=vmem_limit),
        cost_estimate=pl.CostEstimate(
            flops=flops, transcendentals=0, bytes_accessed=bytes_accessed),
    )(x2, w1, b1_2d, w2, b2_2d)

    return out.reshape(N, k, out_dim)


def _init_linear(key, fan_in, fan_out, dtype=jnp.float32):
    # Mimic PyTorch nn.Linear default init: U(-1/sqrt(fan_in), 1/sqrt(fan_in)).
    kw, kb = jax.random.split(key)
    bound = 1.0 / jnp.sqrt(jnp.asarray(fan_in, dtype))
    w = jax.random.uniform(kw, (fan_in, fan_out), dtype, -bound, bound)
    b = jax.random.uniform(kb, (fan_out,), dtype, -bound, bound)
    return w, b


def _reference(x, w1, b1, w2, b2):
    h = jnp.maximum(jnp.einsum("nki,io->nko", x, w1) + b1, 0.0)
    return jnp.maximum(jnp.einsum("nkh,ho->nko", h, w2) + b2, 0.0)


if __name__ == "__main__":
    key = jax.random.PRNGKey(0)
    k_x1, k_x2, k_l1, k_l2 = jax.random.split(key, 4)

    in_dim, hidden, out_dim = 40, 64, 64
    w1, b1 = _init_linear(k_l1, in_dim, hidden)
    w2, b2 = _init_linear(k_l2, hidden, out_dim)

    # Case 1: even N*k = 16.
    N1, K1 = 2, 8
    x1 = jax.random.normal(k_x1, (N1, K1, in_dim), jnp.float32)
    y1 = candidate_encoder_simple(x1, w1, b1, w2, b2)
    jax.block_until_ready(y1)
    y1_ref = _reference(x1, w1, b1, w2, b2)
    assert y1.shape == (N1, K1, out_dim)
    assert jnp.allclose(y1, y1_ref, atol=1e-5, rtol=1e-5)

    # Case 2: ragged N*k = 21, exercising boundary masking of the last
    # (or sole) partial row block instead of a wrapper-side pad/slice.
    N2, K2 = 3, 7
    x2 = jax.random.normal(k_x2, (N2, K2, in_dim), jnp.float32)
    y2 = candidate_encoder_simple(x2, w1, b1, w2, b2)
    jax.block_until_ready(y2)
    y2_ref = _reference(x2, w1, b1, w2, b2)
    assert y2.shape == (N2, K2, out_dim)
    assert jnp.allclose(y2, y2_ref, atol=1e-5, rtol=1e-5)

    print("KERNEL_OK")
</pallas_src>

<mosaic_0001>
module attributes {stable_mosaic.version = 11 : i64} {
  func.func @_mlp_kernel(%arg0: i32, %arg1: memref<16x40xf32, #tpu.memory_space<vmem>>, %arg2: memref<40x64xf32, #tpu.memory_space<vmem>>, %arg3: memref<1x64xf32, #tpu.memory_space<vmem>>, %arg4: memref<64x64xf32, #tpu.memory_space<vmem>>, %arg5: memref<1x64xf32, #tpu.memory_space<vmem>>, %arg6: memref<16x64xf32, #tpu.memory_space<vmem>>) attributes {dimension_semantics = [#tpu.dimension_semantics<parallel>], iteration_bounds = array<i64: 1>, scalar_prefetch = 0 : i64, scratch_operands = 0 : i64, tpu.core_type = #tpu.core_type<tc>, window_params = [{transform_indices = @transform_0, window_bounds = array<i64: 16, 40>}, {pipeline_mode = #tpu.pipeline_mode<synchronous>, transform_indices = @transform_1, window_bounds = array<i64: 40, 64>}, {pipeline_mode = #tpu.pipeline_mode<synchronous>, transform_indices = @transform_2, window_bounds = array<i64: 1, 64>}, {pipeline_mode = #tpu.pipeline_mode<synchronous>, transform_indices = @transform_3, window_bounds = array<i64: 64, 64>}, {pipeline_mode = #tpu.pipeline_mode<synchronous>, transform_indices = @transform_4, window_bounds = array<i64: 1, 64>}, {transform_indices = @transform_5, window_bounds = array<i64: 16, 64>}]} {
    %c0 = arith.constant 0 : index
    %c0_0 = arith.constant 0 : index
    %0 = vector.load %arg1[%c0, %c0_0] : memref<16x40xf32, #tpu.memory_space<vmem>>, vector<16x40xf32>
    %c0_1 = arith.constant 0 : index
    %c0_2 = arith.constant 0 : index
    %1 = vector.load %arg2[%c0_1, %c0_2] : memref<40x64xf32, #tpu.memory_space<vmem>>, vector<40x64xf32>
    %cst = arith.constant dense<0.000000e+00> : vector<16x64xf32>
    %2 = tpu.matmul %0, %1, %cst {dimension_numbers = #tpu.dot_dimension_numbers<[1], [0], [0], [1], [0, 0, 1, 1], [], []>} : vector<16x40xf32>, vector<40x64xf32>, vector<16x64xf32> -> vector<16x64xf32>
    %c0_3 = arith.constant 0 : index
    %c0_4 = arith.constant 0 : index
    %3 = vector.load %arg3[%c0_3, %c0_4] : memref<1x64xf32, #tpu.memory_space<vmem>>, vector<1x64xf32>
    %4 = vector.broadcast %3 : vector<1x64xf32> to vector<16x64xf32>
    %5 = arith.addf %2, %4 : vector<16x64xf32>
    %cst_5 = arith.constant 0.000000e+00 : f32
    %6 = vector.broadcast %cst_5 : f32 to vector<16x64xf32>
    %7 = arith.maximumf %5, %6 : vector<16x64xf32>
    %c0_6 = arith.constant 0 : index
    %c0_7 = arith.constant 0 : index
    %8 = vector.load %arg4[%c0_6, %c0_7] : memref<64x64xf32, #tpu.memory_space<vmem>>, vector<64x64xf32>
    %cst_8 = arith.constant dense<0.000000e+00> : vector<16x64xf32>
    %9 = tpu.matmul %7, %8, %cst_8 {dimension_numbers = #tpu.dot_dimension_numbers<[1], [0], [0], [1], [0, 0, 1, 1], [], []>} : vector<16x64xf32>, vector<64x64xf32>, vector<16x64xf32> -> vector<16x64xf32>
    %c0_9 = arith.constant 0 : index
    %c0_10 = arith.constant 0 : index
    %10 = vector.load %arg5[%c0_9, %c0_10] : memref<1x64xf32, #tpu.memory_space<vmem>>, vector<1x64xf32>
    %11 = vector.broadcast %10 : vector<1x64xf32> to vector<16x64xf32>
    %12 = arith.addf %9, %11 : vector<16x64xf32>
    %cst_11 = arith.constant 0.000000e+00 : f32
    %13 = vector.broadcast %cst_11 : f32 to vector<16x64xf32>
    %14 = arith.maximumf %12, %13 : vector<16x64xf32>
    %c0_12 = arith.constant 0 : index
    %c0_13 = arith.constant 0 : index
    %15 = vector.load %arg6[%c0_12, %c0_13] : memref<16x64xf32, #tpu.memory_space<vmem>>, vector<16x64xf32>
    tpu.vector_store %arg6[%c0_12, %c0_13], %14 {strides = array<i32>} : memref<16x64xf32, #tpu.memory_space<vmem>>, vector<16x64xf32>,
    return
  }
  func.func @transform_0(%arg0: i32) -> (i32, i32) {
    %c0_i32 = arith.constant 0 : i32
    %c0_i32_0 = arith.constant 0 : i32
    return %arg0, %c0_i32 : i32, i32
  }
  func.func @transform_1(%arg0: i32) -> (i32, i32) {
    %c0_i32 = arith.constant 0 : i32
    %c0_i32_0 = arith.constant 0 : i32
    %c0_i32_1 = arith.constant 0 : i32
    return %c0_i32, %c0_i32_0 : i32, i32
  }
  func.func @transform_2(%arg0: i32) -> (i32, i32) {
    %c0_i32 = arith.constant 0 : i32
    %c0_i32_0 = arith.constant 0 : i32
    %c0_i32_1 = arith.constant 0 : i32
    return %c0_i32, %c0_i32_0 : i32, i32
  }
  func.func @transform_3(%arg0: i32) -> (i32, i32) {
    %c0_i32 = arith.constant 0 : i32
    %c0_i32_0 = arith.constant 0 : i32
    %c0_i32_1 = arith.constant 0 : i32
    return %c0_i32, %c0_i32_0 : i32, i32
  }
  func.func @transform_4(%arg0: i32) -> (i32, i32) {
    %c0_i32 = arith.constant 0 : i32
    %c0_i32_0 = arith.constant 0 : i32
    %c0_i32_1 = arith.constant 0 : i32
    return %c0_i32, %c0_i32_0 : i32, i32
  }
  func.func @transform_5(%arg0: i32) -> (i32, i32) {
    %c0_i32 = arith.constant 0 : i32
    %c0_i32_0 = arith.constant 0 : i32
    return %arg0, %c0_i32 : i32, i32
  }
}

</mosaic_0001>

<bundles_post_ra>
// kernel: candidate_encoder_simple.1
= control target key start
LH: loop header
LB: loop body
LE: loop exit
PB: predicated region body
PF: predicated region fallthrough
CT: control target
= control target key end

     0   :  { %10 = vsyncpa [#allocation3], 0  ;;  %s573_s0 = inlined_call_operand.hbm [shape: f32[16,40], index: 0, kind: input, shape index: {}]   ;;  %s574_s1 = inlined_call_operand.hbm [shape: f32[40,64], index: 1, kind: input, shape index: {}]   ;;  %s575_s2 = inlined_call_operand.vmem [shape: f32[1,64], index: 2, kind: input, shape index: {}]   ;;  %s576_s3 = inlined_call_operand.hbm [shape: f32[64,64], index: 3, kind: input, shape index: {}]   ;;  %s577_s4 = inlined_call_operand.vmem [shape: f32[1,64], index: 4, kind: input, shape index: {}]   ;;  %s578_s5 = inlined_call_operand.hbm [shape: f32[16,64], index: 5, kind: output, shape index: {}]  }
   0x1   :  { %11 = vsyncpa [#allocation6], 0 }
   0x2   :  { %12 = vsyncpa [#allocation4], 0  ;;  %s458_s18 = smov [#allocation5]   ;;  %s459_s20 = smov [#allocation2]  }
   0x3   :  { %s30_s19 = sshll.u32 %s458_s18, 4  ;;  %s18_s21 = sshll.u32 %s459_s20, 4  ;;  %s31_s19 = int_to_ptr.vmem [resolvable:$true] %s30_s19  ;;  %s494_s21 = int_to_ptr.vmem [resolvable:$true] %s18_s21 }
   0x4   :  { %s364_s24 = scalar_lea.hbm %s574_s1, 640 }
   0x5   :  { %p365_p0 = scmp.ne.s32.totalorder %s574_s1, %s364_s24  ;;  %p368_p1 = scmp.lt.u32.totalorder %s364_s24, %s574_s1 }
   0x7   :  { %p370_p2 = pnand %p368_p1, %p365_p0 }
   0x9   :  { %373 = shalt.err (!%p370_p2)
}
   0xa   :  { %s374_s29 = scalar_lea.vmem %s31_s19, 640  ;;  %p379_p4 = scmp.lt.s32.totalorder %s31_s19, %s31_s19 }
   0xb   :  { %p375_p3 = scmp.ne.s32.totalorder %s31_s19, %s374_s29  ;;  %p380_p5 = scmp.lt.s32.totalorder %s374_s29, %s374_s29 }
   0xd   :  { %p381_p6 = por %p380_p5, %p379_p4 }
   0xf   :  { %p382_p7 = pnand %p381_p6, %p375_p3 }
  0x11   :  { %385 = shalt.err (!%p382_p7)
}
  0x12   :  { %s460_s30 = smov 128   ;;  %s461_s6 = smov 8  }
  0x13   :  { %36 = dma.hbm_to_vmem [thread:$0]  %s574_s1, 640, %s31_s19, [#allocation6], %s460_s30, %s460_s30, %s461_s6  }
  0x14   :  { %s386_s11 = scalar_lea.hbm %s573_s0, 256 }
  0x15   :  { %p387_p8 = scmp.ne.s32.totalorder %s573_s0, %s386_s11  ;;  %p390_p9 = scmp.lt.u32.totalorder %s386_s11, %s573_s0 }
  0x17   :  { %p392_p10 = pnand %p390_p9, %p387_p8 }
  0x19   :  { %395 = shalt.err (!%p392_p10)
}
  0x1a   :  { %s396_s16 = scalar_lea.vmem %s494_s21, 256  ;;  %p401_p12 = scmp.lt.s32.totalorder %s494_s21, %s494_s21 }
  0x1b   :  { %p397_p11 = scmp.ne.s32.totalorder %s494_s21, %s396_s16  ;;  %p402_p13 = scmp.lt.s32.totalorder %s396_s16, %s396_s16 }
  0x1d   :  { %p403_p0 = por %p402_p13, %p401_p12 }
  0x1f   :  { %p404_p1 = pnand %p403_p0, %p397_p11 }
  0x21   :  { %407 = shalt.err (!%p404_p1)
}
  0x22   :  { %24 = dma.hbm_to_vmem [thread:$0]  %s573_s0, 256, %s494_s21, [#allocation3], %s460_s30, %s460_s30, %s461_s6  }
  0x23   :  { %s462_s18 = smov [#allocation7]   ;;  %s408_s23 = scalar_lea.hbm %s576_s3, 1024 }
  0x24   :  { %s44_s19 = sshll.u32 %s462_s18, 4  ;;  %p409_p2 = scmp.ne.s32.totalorder %s576_s3, %s408_s23  ;;  %s45_s19 = int_to_ptr.vmem [resolvable:$true] %s44_s19 }
  0x25   :  { %p412_p3 = scmp.lt.u32.totalorder %s408_s23, %s576_s3 }
  0x27   :  { %p414_p4 = pnand %p412_p3, %p409_p2 }
  0x29   :  { %417 = shalt.err (!%p414_p4)
}
  0x2a   :  { %s418_s28 = scalar_lea.vmem %s45_s19, 1024  ;;  %p423_p6 = scmp.lt.s32.totalorder %s45_s19, %s45_s19 }
  0x2b   :  { %p419_p5 = scmp.ne.s32.totalorder %s45_s19, %s418_s28  ;;  %p424_p7 = scmp.lt.s32.totalorder %s418_s28, %s418_s28 }
  0x2d   :  { %p425_p8 = por %p424_p7, %p423_p6 }
  0x2f   :  { %p426_p9 = pnand %p425_p8, %p419_p5 }
  0x31   :  { %429 = shalt.err (!%p426_p9)
}
  0x32   :  { %50 = dma.hbm_to_vmem [thread:$0]  %s576_s3, 1024, %s45_s19, [#allocation6], %s460_s30, %s460_s30, %s461_s6  }
  0x33   :  { %452 = dma.done.wait [#allocation3], 256  }
  0x34   :  { %453 = vsyncadd [#allocation3], 4294967040 }
  0x35   :  { %454 = dma.done.wait [#allocation6], 1664  }
  0x36   :  { %455 = vsyncadd [#allocation6], 4294965632  ;;  %vm76_vm0 = vcmask 326656   ;;  %v64_v0 = vld [vmem:[#allocation5] sm:$0xff]  ;;  %v65_v1 = vld [vmem:[#allocation5 + $0x8] sm:$0xff]  ;;  %vm175_vm1 = vcmask 523264  }
  0x37   :  { %v66_v2 = vld [vmem:[#allocation5 + $0x10] sm:$0xff]  ;;  %v334_v3 = vpack.c.bf16 %v65_v1, %v64_v0  ;;  %v67_v4 = vld [vmem:[#allocation5 + $0x18] sm:$0xff]  ;;  %v160_v7 = vld [vmem:[#allocation7] sm:$0xff]  ;;  %s463_s9 = smov [#allocation8]  }
  0x38   :  { %v62_v5 = vld [vmem:[#allocation2] sm:$0xff]  ;;  %v338_v6 = vpack.c.bf16 %v67_v4, %v66_v2  ;;  %v162_v10 = vld [vmem:[#allocation7 + $0x10] sm:$0xff]  ;;  %v163_v11 = vld [vmem:[#allocation7 + $0x18] sm:$0xff] }
  0x39   :  { %312 = vmatprep.mubr.msk.f32.mxu0 %vm76_vm0, %v62_v5  ;;  %v161_v8 = vld [vmem:[#allocation7 + $0x8] sm:$0xff]  ;;  %335 = vmatprep.subr.bf16.mxu0 %v334_v3  ;;  %v346_v12 = vpack.c.bf16 %v163_v11, %v162_v10  ;;  %v164_v13 = vld [vmem:[#allocation7 + $0x20] sm:$0xff]  ;;  %v68_v15 = vld [vmem:[#allocation5 + $0x20] sm:$0xff] }
  0x3a   :  { %v342_v9 = vpack.c.bf16 %v161_v8, %v160_v7  ;;  %337 = vmatpush3.bf16.msra.mxu0 %v334_v3  ;;  %v165_v14 = vld [vmem:[#allocation7 + $0x28] sm:$0xff]  ;;  %v63_v17 = vld [vmem:[#allocation2 + $0x8] sm:$0xff]  ;;  %v167_v19 = vld [vmem:[#allocation7 + $0x38] sm:$0xff] }
  0x3b   :  { %339 = vmatprep.subr.bf16.mxu0 %v338_v6  ;;  %v350_v16 = vpack.c.bf16 %v165_v14, %v164_v13  ;;  %v166_v18 = vld [vmem:[#allocation7 + $0x30] sm:$0xff]  ;;  %v279_v21 = vld [vmem:[%s575_s2] ss:$0 sm:$0xff]  ;;  %s266_s2 = sshll.u32 %s463_s9, 4  ;;  %s267_s2 = int_to_ptr.vmem [resolvable:$true] %s266_s2 }
  0x3c   :  { %343 = vmatprep.subr.bf16.mxu1 %v342_v9  ;;  %v354_v20 = vpack.c.bf16 %v167_v19, %v166_v18  ;;  %v282_v28 = vld [vmem:[%s577_s4] ss:$0 sm:$0xff]  ;;  %s430_s10 = scalar_lea.vmem %s267_s2, 256  ;;  %p435_p11 = scmp.lt.s32.totalorder %s267_s2, %s267_s2 }
  0x3d   :  { %345 = vmatpush3.bf16.msra.mxu1 %v342_v9  ;;  %p431_p10 = scmp.ne.s32.totalorder %s267_s2, %s430_s10  ;;  %p436_p12 = scmp.lt.s32.totalorder %s430_s10, %s430_s10 }
  0x3e   :  { %347 = vmatprep.subr.bf16.mxu1 %v346_v12  ;;  %341 = vmatpush3.bf16.msra.mxu0 %v338_v6 }
  0x3f   :  { %310 = vmatprep.subr.mxu0 %v68_v15  ;;  %p437_p13 = por %p436_p12, %p435_p11 }
  0x41   :  { %349 = vmatpush3.bf16.msra.mxu1 %v346_v12  ;;  %p438_p0 = pnand %p437_p13, %p431_p10 }
  0x42   :  { %351 = vmatprep.subr.bf16.mxu1 %v350_v16  ;;  %311 = vmatpush3.msra.mxu0 %v68_v15 }
  0x43   :  { %313 = vmatmul.mubr.msk.f32.vlgmr.msra.gmra.mrb[0].mxu0 %vm76_vm0, %v63_v17 }
  0x45   :  { %353 = vmatpush3.bf16.msra.mxu1 %v350_v16 }
  0x46   :  { %355 = vmatprep.subr.bf16.mxu1 %v354_v20 }
  0x49   :  { %357 = vmatpush3.bf16.msra.mxu1 %v354_v20 }
 0x116   :  { %v314_v22 = vpop.f32.mrb[0].mxu0 }
 0x117   :  { %v155_v23 = vadd.f32 %v314_v22, %v279_v21  ;;  %v149_v24 = vpop.f32.mrb[1].mxu0 }
 0x118   :  { %v150_v25 = vadd.f32 %v279_v21, %v149_v24 }
 0x119   :  { %v159_v27 = vmax.f32 %v155_v23, 0.0 }
 0x11a   :  { %v158_v26 = vmax.f32 %v150_v25, 0.0 }
 0x11c   :  { %331 = vmatprep.mubr.msk.f32.mxu1 %vm175_vm1, %v158_v26 }
 0x11d   :  { %332 = vmatmul.mubr.msk.f32.vlgmr.msra.gmra.mrb[0].mxu1 %vm175_vm1, %v159_v27 }
 0x1f0   :  { %v333_v29 = vpop.f32.mrb[0].mxu1 }
 0x1f1   :  { %v254_v30 = vadd.f32 %v333_v29, %v282_v28  ;;  %v248_v31 = vpop.f32.mrb[1].mxu1 }
 0x1f2   :  { %v249_v32 = vadd.f32 %v282_v28, %v248_v31 }
 0x1f3   :  { %v258_v33 = vmax.f32 %v254_v30, 0.0 }
 0x1f4   :  { %v257_v34 = vmax.f32 %v249_v32, 0.0 }
 0x1f5   :  { %260 = vst.msk [vmem:[#allocation8 + $0x8] sm:$0xff] %vm175_vm1, %v258_v33 }
 0x1f6   :  { %259 = vst.msk [vmem:[#allocation8] sm:$0xff] %vm175_vm1, %v257_v34 }
 0x1f7   :  { %441 = shalt.err (!%p438_p0)
}
 0x1f8   :  { %s442_s12 = scalar_lea.hbm %s578_s5, 256 }
 0x1f9   :  { %p443_p1 = scmp.ne.s32.totalorder %s578_s5, %s442_s12  ;;  %p446_p2 = scmp.lt.u32.totalorder %s442_s12, %s578_s5 }
 0x1fb   :  { %p448_p3 = pnand %p446_p2, %p443_p1 }
 0x1fd   :  { %451 = shalt.err (!%p448_p3)
}
 0x1fe   :  { %272 = dma.vmem_to_hbm [thread:$0]  %s267_s2, 256, %s578_s5, [#allocation4], %s460_s30, %s460_s30, %s461_s6  }
 0x1ff   :  { %456 = dma.done.wait [#allocation4], 256  }
 0x200   :  { %457 = vsyncadd [#allocation4], 4294967040 }
 0x201   :  { %276 = vsyncpa [#allocation3], 1 }
 0x202   :  { %277 = vsyncpa [#allocation6], 1 }
 0x203   :  { %278 = vsyncpa [#allocation4], 1 }

</bundles_post_ra>
